<compile_context>
chip_gen: v7x
topology: tpu7x:2x2x1
jax: 0.10.0
libtpu: 0.0.40
codegen_flags: <defaults>
</compile_context>

<pallas_src>
import numpy as np
import jax
import jax.numpy as jnp
from jax.experimental import pallas as pl
from jax.experimental.pallas import tpu as pltpu


_FEAT_CHANNELS = (64, 128, 320, 512)   # pvt_v2_b2 pyramid channels
_FEAT_STRIDES = (4, 8, 16, 32)
_CH = 32                               # head channels (module default)


# ----------------------------------------------------------------------------
# Helpers
# ----------------------------------------------------------------------------
def _round_up(x: int, m: int) -> int:
    return ((x + m - 1) // m) * m


def _bilinear_matrix(out_size: int, in_size: int) -> jnp.ndarray:
    """Interpolation matrix R (out, in) for bilinear, align_corners=True."""
    if in_size == 1:
        return jnp.ones((out_size, 1), jnp.float32)
    if out_size == 1:
        src = np.zeros((1,), np.float64)
    else:
        src = np.arange(out_size, dtype=np.float64) * (in_size - 1) / (out_size - 1)
    i0 = np.clip(np.floor(src).astype(np.int64), 0, in_size - 1)
    i1 = np.minimum(i0 + 1, in_size - 1)
    w1 = src - i0
    w0 = 1.0 - w1
    R = np.zeros((out_size, in_size), np.float64)
    R[np.arange(out_size), i0] += w0
    R[np.arange(out_size), i1] += w1
    return jnp.asarray(R, jnp.float32)


def _choose_row_tile(H: int, W_pad: int, budget_bytes: int = 4 << 20) -> int:
    """Row tile (multiple of 8) sized so the live (TH, W_pad) f32 tiles fit budget."""
    max_th = max(8, budget_bytes // (4 * 4 * W_pad))   # ~4 live full-width tiles
    th = min(256, max_th)
    th = max(8, (th // 8) * 8)
    th = min(th, _round_up(H, 8))
    return th


# ----------------------------------------------------------------------------
# Fused Pallas kernel: per-level separable bilinear upsample of a single
# pre-projected plane + level sum + folded bias, one HBM write per tile.
# ----------------------------------------------------------------------------
def _make_kernel(n_mat: int, TH: int, W_pad: int):
    def kernel(*refs):
        p_refs = refs[:n_mat]                 # (1, h_l, w_l) projected planes
        r_refs = refs[n_mat:3 * n_mat]        # (rh_l, rw_l) pairs
        bias_ref = refs[3 * n_mat]            # (1, 1, 1) per-batch scalar bias
        o_ref = refs[3 * n_mat + 1]           # (1, 1, TH, W_pad)

        acc = jnp.zeros((TH, W_pad), jnp.float32)
        for i in range(n_mat):
            rh_ref = r_refs[2 * i]            # (TH, h_l)
            rw_ref = r_refs[2 * i + 1]        # (w_l, W_pad)
            # Height resize: (TH, h) @ (h, w) -> (TH, w)   (MXU)
            t = jnp.dot(rh_ref[...], p_refs[i][0],
                        preferred_element_type=jnp.float32)
            # Width resize + accumulate: (TH, w) @ (w, W_pad)
            acc = acc + jnp.dot(t, rw_ref[...],
                                preferred_element_type=jnp.float32)
        # 1x1-level contribution + BN-shift / out-conv bias, folded to a scalar.
        acc = acc + bias_ref[0]
        o_ref[0, 0] = acc.astype(o_ref.dtype)
    return kernel


def fused_upsample_head_out(feats, head_w, bn_scale, bn_shift, out_w, out_b,
                            H, W):
    """feats: list of 4 NCHW pyramid features -> (N, 1, H, W) output."""
    N = int(feats[0].shape[0])
    level_shapes = [(int(f.shape[2]), int(f.shape[3]), int(f.shape[1]))
                    for f in feats]

    # --- Fold head(1x1, no bias) + eval-BN + out(1x1, bias) to one channel ---
    # out = sum_k feats[k] * v[k] + const, v = head_w @ (bn_scale * out_w)
    v_full = head_w @ (bn_scale * out_w)                 # (1024,)
    const = jnp.sum(bn_shift * out_w) + out_b            # scalar

    planes, mat_shapes = [], []
    bias = jnp.zeros((N,), jnp.float32) + const
    off = 0
    for f, (h, w, C) in zip(feats, level_shapes):
        v_l = v_full[off:off + C]
        off += C
        # Tiny low-res projection hoisted out of the kernel (XLA einsum).
        plane = jnp.einsum("nchw,c->nhw", f.astype(jnp.float32), v_l)  # (N,h,w)
        if h == 1 and w == 1:
            # align_corners upsample of a 1x1 plane == per-batch scalar.
            bias = bias + plane[:, 0, 0]
        else:
            planes.append(plane)
            mat_shapes.append((h, w))
    bias = bias.reshape(N, 1, 1)
    assert off == head_w.shape[0]

    # --- Tiling / padding (lane-dense output, VMEM-budgeted row tile) ---
    W_pad = _round_up(W, 128)
    TH = _choose_row_tile(H, W_pad)
    H_pad = _round_up(H, TH)
    n_rt = H_pad // TH

    rmats = []
    for (h, w) in mat_shapes:
        rh = _bilinear_matrix(H, h)                      # (H, h)
        if H_pad > H:
            rh = jnp.pad(rh, ((0, H_pad - H), (0, 0)))
        rw = jnp.transpose(_bilinear_matrix(W, w))       # (w, W)
        if W_pad > W:
            rw = jnp.pad(rw, ((0, 0), (0, W_pad - W)))
        rmats.extend([rh, rw])

    in_specs = []
    for (h, w) in mat_shapes:
        in_specs.append(pl.BlockSpec((1, h, w), lambda n, r: (n, 0, 0)))
    for (h, w) in mat_shapes:
        in_specs.append(pl.BlockSpec((TH, h), lambda n, r: (r, 0)))
        in_specs.append(pl.BlockSpec((w, W_pad), lambda n, r: (0, 0)))
    in_specs.append(pl.BlockSpec((1, 1, 1), lambda n, r: (n, 0, 0)))  # bias

    # Explicit VMEM limit (footprint is tiny after the 1-channel fold).
    est = 4 * (5 * TH * W_pad)
    for (h, w) in mat_shapes:
        est += 4 * (2 * h * w + 2 * TH * h + 2 * w * W_pad + TH * w)
    vmem_limit = int(min(48 << 20, max(16 << 20, 2 * est)))

    kernel = _make_kernel(len(mat_shapes), TH, W_pad)

    out = pl.pallas_call(
        kernel,
        out_shape=jax.ShapeDtypeStruct((N, 1, H_pad, W_pad), jnp.float32),
        grid=(N, n_rt),
        in_specs=in_specs,
        out_specs=pl.BlockSpec((1, 1, TH, W_pad), lambda n, r: (n, 0, r, 0)),
        compiler_params=pltpu.CompilerParams(
            dimension_semantics=("parallel", "parallel"),
            vmem_limit_bytes=vmem_limit),
    )(*planes, *rmats, bias)

    return out[:, :, :H, :W]


# ----------------------------------------------------------------------------
# Deterministic parameter construction + backbone stand-in
# ----------------------------------------------------------------------------
def make_params(key):
    keys = jax.random.split(key, 8)
    params = {}
    # Backbone stand-in channel projections (3 -> C_i).
    params["bb_proj"] = [
        0.1 * jax.random.normal(keys[i], (3, c), jnp.float32)
        for i, c in enumerate(_FEAT_CHANNELS)
    ]
    # head: Conv2d(1024, 32, 1, bias=False)  (stored as (1024, 32)).
    params["head_w"] = 0.02 * jax.random.normal(
        keys[4], (sum(_FEAT_CHANNELS), _CH), jnp.float32)
    # Eval-mode BatchNorm2d(32) folded to affine:
    #   bn_scale = gamma / sqrt(running_var + eps),
    #   bn_shift = beta - running_mean * bn_scale.
    # Randomized (non-trivial) values so the algebraic fold is exercised.
    params["bn_scale"] = 1.0 + 0.1 * jax.random.normal(keys[5], (_CH,), jnp.float32)
    params["bn_shift"] = 0.1 * jax.random.normal(keys[6], (_CH,), jnp.float32)
    # out: Conv2d(32, 1, 1) with bias.
    params["out_w"] = 0.05 * jax.random.normal(keys[7], (_CH,), jnp.float32)
    params["out_b"] = jnp.float32(0.01)
    return params


def fake_pvt_backbone(x, bb_proj):
    # TODO(synk): stand-in for pretrained pvt_v2_b2 (attention/MLP stages not translated).
    N, C, H, W = x.shape
    feats = []
    for stride, wp in zip(_FEAT_STRIDES, bb_proj):
        h, w = H // stride, W // stride
        xs = x.reshape(N, C, h, stride, w, stride).mean(axis=(3, 5))  # (N, 3, h, w)
        feats.append(jnp.einsum("nchw,cd->ndhw", xs, wp))             # (N, C_i, h, w)
    return feats


def pvt_encoder_net_1(x, params):
    N, _, H, W = x.shape
    pvt = fake_pvt_backbone(x, params["bb_proj"])
    return fused_upsample_head_out(
        pvt, params["head_w"], params["bn_scale"], params["bn_shift"],
        params["out_w"], params["out_b"], int(H), int(W))


# ----------------------------------------------------------------------------
# Pure-JAX reference (same math in the original module's op order)
# ----------------------------------------------------------------------------
def _reference(x, params):
    N, _, H, W = x.shape
    pvt = fake_pvt_backbone(x, params["bb_proj"])
    ups = []
    for f in pvt:
        h, w = int(f.shape[2]), int(f.shape[3])
        Rh = _bilinear_matrix(H, h)
        Rw = _bilinear_matrix(W, w)
        ups.append(jnp.einsum("Hh,nchw,Ww->ncHW", Rh, f, Rw))
    feats = jnp.concatenate(ups, axis=1)                               # (N,1024,H,W)
    head = jnp.einsum("nkHW,kd->ndHW", feats, params["head_w"])        # head 1x1 conv
    head = (head * params["bn_scale"].reshape(1, _CH, 1, 1)
            + params["bn_shift"].reshape(1, _CH, 1, 1))                # BN (eval)
    out = jnp.einsum("ndHW,d->nHW", head, params["out_w"])             # out 1x1 conv
    return out[:, None] + params["out_b"]


# ----------------------------------------------------------------------------
if __name__ == "__main__":
    key = jax.random.PRNGKey(0)
    k_in, k_par = jax.random.split(key)
    # Small input consistent with the module: NCHW, 3-channel RGB, 32x32.
    x = jax.random.normal(k_in, (2, 3, 32, 32), jnp.float32)
    params = make_params(k_par)

    out = jax.block_until_ready(pvt_encoder_net_1(x, params))
    assert out.shape == (2, 1, 32, 32), out.shape
    assert out.dtype == jnp.float32

    ref = jax.block_until_ready(_reference(x, params))
    err = float(jnp.max(jnp.abs(out - ref)))
    assert jnp.allclose(out, ref, rtol=1e-3, atol=1e-3), err

    print("KERNEL_OK")
</pallas_src>

<mosaic_0001>
module attributes {stable_mosaic.version = 11 : i64} {
  func.func @kernel(%arg0: i32, %arg1: i32, %arg2: memref<1x8x8xf32, #tpu.memory_space<vmem>>, %arg3: memref<1x4x4xf32, #tpu.memory_space<vmem>>, %arg4: memref<1x2x2xf32, #tpu.memory_space<vmem>>, %arg5: memref<32x8xf32, #tpu.memory_space<vmem>>, %arg6: memref<8x128xf32, #tpu.memory_space<vmem>>, %arg7: memref<32x4xf32, #tpu.memory_space<vmem>>, %arg8: memref<4x128xf32, #tpu.memory_space<vmem>>, %arg9: memref<32x2xf32, #tpu.memory_space<vmem>>, %arg10: memref<2x128xf32, #tpu.memory_space<vmem>>, %arg11: memref<1x1x1xf32, #tpu.memory_space<vmem>>, %arg12: memref<1x1x32x128xf32, #tpu.memory_space<vmem>>) attributes {dimension_semantics = [#tpu.dimension_semantics<parallel>, #tpu.dimension_semantics<parallel>], iteration_bounds = array<i64: 2, 1>, scalar_prefetch = 0 : i64, scratch_operands = 0 : i64, tpu.core_type = #tpu.core_type<tc>, window_params = [{transform_indices = @transform_0, window_bounds = array<i64: 1, 8, 8>}, {transform_indices = @transform_1, window_bounds = array<i64: 1, 4, 4>}, {transform_indices = @transform_2, window_bounds = array<i64: 1, 2, 2>}, {transform_indices = @transform_3, window_bounds = array<i64: 32, 8>}, {pipeline_mode = #tpu.pipeline_mode<synchronous>, transform_indices = @transform_4, window_bounds = array<i64: 8, 128>}, {transform_indices = @transform_5, window_bounds = array<i64: 32, 4>}, {pipeline_mode = #tpu.pipeline_mode<synchronous>, transform_indices = @transform_6, window_bounds = array<i64: 4, 128>}, {transform_indices = @transform_7, window_bounds = array<i64: 32, 2>}, {pipeline_mode = #tpu.pipeline_mode<synchronous>, transform_indices = @transform_8, window_bounds = array<i64: 2, 128>}, {transform_indices = @transform_9, window_bounds = array<i64: 1, 1, 1>}, {transform_indices = @transform_10, window_bounds = array<i64: 1, 1, 32, 128>}]} {
    %cst = arith.constant 0.000000e+00 : f32
    %0 = vector.broadcast %cst : f32 to vector<32x128xf32>
    %c0 = arith.constant 0 : index
    %c0_0 = arith.constant 0 : index
    %1 = vector.load %arg5[%c0, %c0_0] : memref<32x8xf32, #tpu.memory_space<vmem>>, vector<32x8xf32>
    %c0_1 = arith.constant 0 : index
    %c0_2 = arith.constant 0 : index
    %c0_3 = arith.constant 0 : index
    %2 = vector.load %arg2[%c0_1, %c0_2, %c0_3] : memref<1x8x8xf32, #tpu.memory_space<vmem>>, vector<1x8x8xf32>
    %3 = vector.shape_cast %2 : vector<1x8x8xf32> to vector<8x8xf32>
    %cst_4 = arith.constant dense<0.000000e+00> : vector<32x8xf32>
    %4 = tpu.matmul %1, %3, %cst_4 {dimension_numbers = #tpu.dot_dimension_numbers<[1], [0], [0], [1], [0, 0, 1, 1], [], []>} : vector<32x8xf32>, vector<8x8xf32>, vector<32x8xf32> -> vector<32x8xf32>
    %c0_5 = arith.constant 0 : index
    %c0_6 = arith.constant 0 : index
    %5 = vector.load %arg6[%c0_5, %c0_6] : memref<8x128xf32, #tpu.memory_space<vmem>>, vector<8x128xf32>
    %cst_7 = arith.constant dense<0.000000e+00> : vector<32x128xf32>
    %6 = tpu.matmul %4, %5, %cst_7 {dimension_numbers = #tpu.dot_dimension_numbers<[1], [0], [0], [1], [0, 0, 1, 1], [], []>} : vector<32x8xf32>, vector<8x128xf32>, vector<32x128xf32> -> vector<32x128xf32>
    %7 = arith.addf %0, %6 : vector<32x128xf32>
    %c0_8 = arith.constant 0 : index
    %c0_9 = arith.constant 0 : index
    %8 = vector.load %arg7[%c0_8, %c0_9] : memref<32x4xf32, #tpu.memory_space<vmem>>, vector<32x4xf32>
    %c0_10 = arith.constant 0 : index
    %c0_11 = arith.constant 0 : index
    %c0_12 = arith.constant 0 : index
    %9 = vector.load %arg3[%c0_10, %c0_11, %c0_12] : memref<1x4x4xf32, #tpu.memory_space<vmem>>, vector<1x4x4xf32>
    %10 = vector.shape_cast %9 : vector<1x4x4xf32> to vector<4x4xf32>
    %cst_13 = arith.constant dense<0.000000e+00> : vector<32x4xf32>
    %11 = tpu.matmul %8, %10, %cst_13 {dimension_numbers = #tpu.dot_dimension_numbers<[1], [0], [0], [1], [0, 0, 1, 1], [], []>} : vector<32x4xf32>, vector<4x4xf32>, vector<32x4xf32> -> vector<32x4xf32>
    %c0_14 = arith.constant 0 : index
    %c0_15 = arith.constant 0 : index
    %12 = vector.load %arg8[%c0_14, %c0_15] : memref<4x128xf32, #tpu.memory_space<vmem>>, vector<4x128xf32>
    %cst_16 = arith.constant dense<0.000000e+00> : vector<32x128xf32>
    %13 = tpu.matmul %11, %12, %cst_16 {dimension_numbers = #tpu.dot_dimension_numbers<[1], [0], [0], [1], [0, 0, 1, 1], [], []>} : vector<32x4xf32>, vector<4x128xf32>, vector<32x128xf32> -> vector<32x128xf32>
    %14 = arith.addf %7, %13 : vector<32x128xf32>
    %c0_17 = arith.constant 0 : index
    %c0_18 = arith.constant 0 : index
    %15 = vector.load %arg9[%c0_17, %c0_18] : memref<32x2xf32, #tpu.memory_space<vmem>>, vector<32x2xf32>
    %c0_19 = arith.constant 0 : index
    %c0_20 = arith.constant 0 : index
    %c0_21 = arith.constant 0 : index
    %16 = vector.load %arg4[%c0_19, %c0_20, %c0_21] : memref<1x2x2xf32, #tpu.memory_space<vmem>>, vector<1x2x2xf32>
    %17 = vector.shape_cast %16 : vector<1x2x2xf32> to vector<2x2xf32>
    %cst_22 = arith.constant dense<0.000000e+00> : vector<32x2xf32>
    %18 = tpu.matmul %15, %17, %cst_22 {dimension_numbers = #tpu.dot_dimension_numbers<[1], [0], [0], [1], [0, 0, 1, 1], [], []>} : vector<32x2xf32>, vector<2x2xf32>, vector<32x2xf32> -> vector<32x2xf32>
    %c0_23 = arith.constant 0 : index
    %c0_24 = arith.constant 0 : index
    %19 = vector.load %arg10[%c0_23, %c0_24] : memref<2x128xf32, #tpu.memory_space<vmem>>, vector<2x128xf32>
    %cst_25 = arith.constant dense<0.000000e+00> : vector<32x128xf32>
    %20 = tpu.matmul %18, %19, %cst_25 {dimension_numbers = #tpu.dot_dimension_numbers<[1], [0], [0], [1], [0, 0, 1, 1], [], []>} : vector<32x2xf32>, vector<2x128xf32>, vector<32x128xf32> -> vector<32x128xf32>
    %21 = arith.addf %14, %20 : vector<32x128xf32>
    %c0_26 = arith.constant 0 : index
    %c0_27 = arith.constant 0 : index
    %c0_28 = arith.constant 0 : index
    %22 = vector.load %arg11[%c0_26, %c0_27, %c0_28] : memref<1x1x1xf32, #tpu.memory_space<vmem>>, vector<1x1x1xf32>
    %23 = vector.shape_cast %22 : vector<1x1x1xf32> to vector<1x1xf32>
    %24 = vector.broadcast %23 : vector<1x1xf32> to vector<32x128xf32>
    %25 = arith.addf %21, %24 : vector<32x128xf32>
    %c0_29 = arith.constant 0 : index
    %c0_30 = arith.constant 0 : index
    %c0_31 = arith.constant 0 : index
    %c0_32 = arith.constant 0 : index
    %26 = vector.load %arg12[%c0_29, %c0_30, %c0_31, %c0_32] : memref<1x1x32x128xf32, #tpu.memory_space<vmem>>, vector<1x1x32x128xf32>
    %27 = vector.shape_cast %26 : vector<1x1x32x128xf32> to vector<32x128xf32>
    %28 = vector.shape_cast %25 : vector<32x128xf32> to vector<1x1x32x128xf32>
    tpu.vector_store %arg12[%c0_29, %c0_30, %c0_31, %c0_32], %28 {strides = array<i32>} : memref<1x1x32x128xf32, #tpu.memory_space<vmem>>, vector<1x1x32x128xf32>,
    return
  }
  func.func @transform_0(%arg0: i32, %arg1: i32) -> (i32, i32, i32) {
    %c0_i32 = arith.constant 0 : i32
    %c0_i32_0 = arith.constant 0 : i32
    %c0_i32_1 = arith.constant 0 : i32
    return %arg0, %c0_i32, %c0_i32_0 : i32, i32, i32
  }
  func.func @transform_1(%arg0: i32, %arg1: i32) -> (i32, i32, i32) {
    %c0_i32 = arith.constant 0 : i32
    %c0_i32_0 = arith.constant 0 : i32
    %c0_i32_1 = arith.constant 0 : i32
    return %arg0, %c0_i32, %c0_i32_0 : i32, i32, i32
  }
  func.func @transform_2(%arg0: i32, %arg1: i32) -> (i32, i32, i32) {
    %c0_i32 = arith.constant 0 : i32
    %c0_i32_0 = arith.constant 0 : i32
    %c0_i32_1 = arith.constant 0 : i32
    return %arg0, %c0_i32, %c0_i32_0 : i32, i32, i32
  }
  func.func @transform_3(%arg0: i32, %arg1: i32) -> (i32, i32) {
    %c0_i32 = arith.constant 0 : i32
    %c0_i32_0 = arith.constant 0 : i32
    return %arg1, %c0_i32 : i32, i32
  }
  func.func @transform_4(%arg0: i32, %arg1: i32) -> (i32, i32) {
    %c0_i32 = arith.constant 0 : i32
    %c0_i32_0 = arith.constant 0 : i32
    %c0_i32_1 = arith.constant 0 : i32
    return %c0_i32, %c0_i32_0 : i32, i32
  }
  func.func @transform_5(%arg0: i32, %arg1: i32) -> (i32, i32) {
    %c0_i32 = arith.constant 0 : i32
    %c0_i32_0 = arith.constant 0 : i32
    return %arg1, %c0_i32 : i32, i32
  }
  func.func @transform_6(%arg0: i32, %arg1: i32) -> (i32, i32) {
    %c0_i32 = arith.constant 0 : i32
    %c0_i32_0 = arith.constant 0 : i32
    %c0_i32_1 = arith.constant 0 : i32
    return %c0_i32, %c0_i32_0 : i32, i32
  }
  func.func @transform_7(%arg0: i32, %arg1: i32) -> (i32, i32) {
    %c0_i32 = arith.constant 0 : i32
    %c0_i32_0 = arith.constant 0 : i32
    return %arg1, %c0_i32 : i32, i32
  }
  func.func @transform_8(%arg0: i32, %arg1: i32) -> (i32, i32) {
    %c0_i32 = arith.constant 0 : i32
    %c0_i32_0 = arith.constant 0 : i32
    %c0_i32_1 = arith.constant 0 : i32
    return %c0_i32, %c0_i32_0 : i32, i32
  }
  func.func @transform_9(%arg0: i32, %arg1: i32) -> (i32, i32, i32) {
    %c0_i32 = arith.constant 0 : i32
    %c0_i32_0 = arith.constant 0 : i32
    %c0_i32_1 = arith.constant 0 : i32
    return %arg0, %c0_i32, %c0_i32_0 : i32, i32, i32
  }
  func.func @transform_10(%arg0: i32, %arg1: i32) -> (i32, i32, i32, i32) {
    %c0_i32 = arith.constant 0 : i32
    %c0_i32_0 = arith.constant 0 : i32
    %c0_i32_1 = arith.constant 0 : i32
    return %arg0, %c0_i32, %arg1, %c0_i32_0 : i32, i32, i32, i32
  }
}

</mosaic_0001>

<bundles_post_ra>
// kernel: tpu_custom_call.1
= control target key start
LH: loop header
LB: loop body
LE: loop exit
PB: predicated region body
PF: predicated region fallthrough
CT: control target
= control target key end

     0   :  { %15 = vsyncpa [#allocation3], 0  ;;  %s1828_s0 = inlined_call_operand.vmem [shape: f32[2,8,8], index: 0, kind: input, shape index: {}]   ;;  %s1829_s1 = inlined_call_operand.vmem [shape: f32[2,4,4], index: 1, kind: input, shape index: {}]   ;;  %s1830_s2 = inlined_call_operand.vmem [shape: f32[2,2,2], index: 2, kind: input, shape index: {}]   ;;  %s1831_s3 = inlined_call_operand.vmem [shape: f32[32,8], index: 3, kind: input, shape index: {}]   ;;  %s1832_s4 = inlined_call_operand.vmem [shape: f32[8,128], index: 4, kind: input, shape index: {}]   ;;  %s1833_s5 = inlined_call_operand.vmem [shape: f32[32,4], index: 5, kind: input, shape index: {}]   ;;  %s1834_s6 = inlined_call_operand.vmem [shape: f32[4,128], index: 6, kind: input, shape index: {}]   ;;  %s1835_s7 = inlined_call_operand.vmem [shape: f32[32,2], index: 7, kind: input, shape index: {}]   ;;  %s1836_s8 = inlined_call_operand.vmem [shape: f32[2,128], index: 8, kind: input, shape index: {}]   ;;  %s1837_s9 = inlined_call_operand.vmem [shape: f32[2,1,1], index: 9, kind: input, shape index: {}]   ;;  %s1838_s10 = inlined_call_operand.hbm [shape: f32[2,1,32,128], index: 10, kind: output, shape index: {}]  }
   0x1   :  { %17 = vsyncpa [#allocation3 + $0x1], 0  ;;  %s1621_s13 = smov 0   ;;  %s1623_s14 = smov 0  }
   0x2   :  { %s1625_s15 = smov 0   ;;  %s1627_s16 = smov 0  }
   0x3   :  { %s1629_s17 = smov 0   ;;  %s1631_s18 = smov 0  }
   0x4 LB: > { %1843 = sst [smem:[#allocation5_spill]] %s1548_s15  ;;  %s1290_s19 = sadd.s32 4294967295, %s1560_s18   ;;  %s1560_s18 = sphi %s1631_s18, %s23_s18   ;;  %s1556_s17 = sphi %s1629_s17, %s1854_s17   ;;  %s1552_s16 = sphi %s1627_s16, %s1853_s16   ;;  %s1548_s15 = sphi %s1625_s15, %s1852_s15   ;;  %s1544_s14 = sphi %s1623_s14, %s1856_s14   ;;  %s1540_s13 = sphi %s1621_s13, %s1855_s13  }
   0x5   : > { %1844 = sst [smem:[#allocation6_spill]] %s1556_s17  ;;  %s1291_s20 = sadd.s32 4294967294, %s1560_s18  }
   0x6   : > { %s35_s21 = sadd.s32 1, %s1556_s17  ;;  %s289_s22 = sadd.s32 1, %s1548_s15 }
   0x7   : > { %p37_p0 = scmp.ge.s32.totalorder %s35_s21, 2  ;;  %p299_p1 = scmp.ne.s32.totalorder %s1548_s15, %s1544_s14 }
   0x8   : > { %p300_p2 = scmp.eq.s32.totalorder %s1290_s19, 1  ;;  %p305_p3 = scmp.ne.s32.totalorder %s1544_s14, %s1540_s13 }
   0x9   : > { %s1858_s21 = smov (%p37_p0, %s35_s21), 0  ;;  %p306_p5 = scmp.eq.s32.totalorder %s1291_s20, 1 }
   0xa   : > { %1845 = sst [smem:[#allocation7_spill]] %s1858_s21  ;;  %p1661_p4 = por %p300_p2, %p299_p1 }
   0xb   : > { %s284_s24 = ssub.s32 %s1556_s17, %s1858_s21  ;;  %p1297_p6 = scmp.ge.s32.totalorder %s1560_s18, 1 }
   0xc   : > { %p287_p7 = scmp.eq.s32.totalorder %s284_s24, 0  ;;  %p1668_p8 = por %p306_p5, %p305_p3 }
   0xd   : > { %p387_p9 = scmp.lt.s32.totalorder %s1560_s18, 3 }
   0xe   : > { %s1847_s25 = scalar_select %p1668_p8, 1, 0 }
   0xf   : > { %s1674_s26 = scalar_select %p287_p7, %s1548_s15, %s289_s22  }
  0x10   : > { %1848 = sst [smem:[#allocation8_spill]] %s1847_s25  ;;  %p388_p10 = pnand %p1297_p6, %p387_p9 }
  0x11   : > { %1849 = sst [smem:[#allocation9_spill]] %s1674_s26  ;;  %p450_p11 = scmp.lt.s32.totalorder (!%p388_p10), %s1552_s16, 1  ;;  %v484_v0 = vld [vmem:[%s1831_s3] sm:$0xff] (!%p388_p10)  ;;  %vm489_vm0 = vcmask (!%p388_p10), 64512   ;;  %v485_v2 = vld [vmem:[%s1831_s3 + $0x8] sm:$0xff] (!%p388_p10)  ;;  %vm606_vm1 = vcmask (!%p388_p10), 1043456  }
  0x12   : > { %391 = sbr.rel (%p388_p10) target bundleno = 504 (0x1f8), region = 60  ;;  %1369 = vmatprep.mubr.msk.f32.mxu1 (!%p388_p10), %vm489_vm0, %v484_v0  ;;  %v486_v4 = vld [vmem:[%s1831_s3 + $0x10] sm:$0xff] (!%p388_p10)  ;;  %vm911_vm2 = vcmask (!%p388_p10), 1041408   ;;  %v487_v6 = vld [vmem:[%s1831_s3 + $0x18] sm:$0xff] (!%p388_p10)  ;;  %v588_v7 = vld [vmem:[%s1833_s5] sm:$0xff] (!%p388_p10)  ;;  %vm593_vm3 = vcmask (!%p388_p10), 31744  }
  0x13   : > { %v589_v8 = vld [vmem:[%s1833_s5 + $0x8] sm:$0xff] (!%p388_p10)  ;;  %v590_v9 = vld [vmem:[%s1833_s5 + $0x10] sm:$0xff] (!%p388_p10)  ;;  %v591_v10 = vld [vmem:[%s1833_s5 + $0x18] sm:$0xff] (!%p388_p10)  ;;  %vm898_vm4 = vcmask (!%p388_p10), 15360   ;;  %v1562_v17 = vmov (!%p388_p10), 0   ;;  %s1336_s15 = sshll.u32 (!%p388_p10), %s1552_s16, 9 }
  0x14   : > { %v893_v11 = vld [vmem:[%s1835_s7] sm:$0xff] (!%p388_p10)  ;;  %v894_v12 = vld [vmem:[%s1835_s7 + $0x8] sm:$0xff] (!%p388_p10)  ;;  %v895_v13 = vld [vmem:[%s1835_s7 + $0x10] sm:$0xff] (!%p388_p10)  ;;  %1481 = vset.pattern.permute.xlu0 (!%p388_p10), %v1562_v17  ;;  %s1780_s25 = scalar_lea.hbm (!%p388_p10), %s1838_s10, %s1336_s15 }
  0x15   : > { %v896_v14 = vld [vmem:[%s1835_s7 + $0x18] sm:$0xff] (!%p388_p10)  ;;  %v695_v15 = vld [vmem:[%s1834_s6] sm:$0xf] (!%p388_p10) }
  0x16   : > { %1383 = vmatprep.subr.msk.mxu0 (!%p388_p10), %vm606_vm1, %v695_v15  ;;  %v587_v16 = vld [vmem:[%s1832_s4] sm:$0xff] (!%p388_p10) }
  0x17   : > { %1384 = vmatpush3.msk.msra.mxu0 (!%p388_p10), %vm606_vm1, %v695_v15  ;;  %v1000_v25 = vld [vmem:[%s1836_s8] sm:$0x3] (!%p388_p10) }
  0x18   : > { %1391 = vmatprep.subr.mxu0 (!%p388_p10), %v587_v16 }
  0x19   : > { %s1682_s29 = scalar_select %p450_p11, %s1552_s16, 1 }
  0x1b   : > { %s1299_s30 = sshll.u32 %s1682_s29, 3  ;;  %s1300_s11 = sshll.u32 %s1682_s29, 2 }
  0x1c   : > { %s453_s20 = scalar_lea.vmem %s1828_s0, %s1299_s30  ;;  %s457_s21 = scalar_lea.vmem %s1829_s1, %s1300_s11 }
  0x1d   : > { %v488_v1 = vld [vmem:[%s453_s20] sm:$0xff]  ;;  %s1301_s17 = sshll.u32 %s1682_s29, 1  ;;  %s482_s27 = scalar_lea.vmem %s1837_s9, %s1682_s29 }
  0x1e   : > { %v592_v3 = vld [vmem:[%s457_s21] sm:$0xf]  ;;  %1367 = vmatprep.subr.mxu1 %v488_v1  ;;  %s461_s30 = scalar_lea.vmem %s1830_s2, %s1301_s17  ;;  %s447_s29 = sand.u32 1, %s1544_s14  }
  0x1f   : > { %1368 = vmatpush3.msra.mxu1 %v488_v1  ;;  %v897_v5 = vld [vmem:[%s461_s30] sm:$0x3]  ;;  %s1298_s30 = sshll.u32 %s447_s29, 5  ;;  %s1782_s19 = scalar_lea.sflag [#allocation3], %s447_s29 }
  0x20   : > { %1370 = vmatmul.mubr.msk.f32.vlgmr.msra.gmra.mrb[0].mxu1 %vm489_vm0, %v485_v2  ;;  %1375 = vmatprep.subr.msk.mxu1 %vm606_vm1, %v592_v3  ;;  %v1330_v18 = vld [vmem:[%s482_s27] ss:$0 sm:$0xff]  ;;  %s449_s21 = scalar_lea.vmem [#allocation2], %s1298_s30  ;;  %s1563_s20 = smov [#allocation2]  }
  0x21   : > { %1376 = vmatpush3.msk.msra.mxu1 %vm606_vm1, %v592_v3  ;;  %1372 = vmatprep.mubr.msk.f32.mxu1 %vm489_vm0, %v486_v4  ;;  %s1139_s11 = sshll.u32 %s449_s21, 4  ;;  %s1486_s22 = sshll.u32 %s1563_s20, 4  ;;  %s1775_s11 = int_to_ptr.vmem [resolvable:$true] %s1139_s11  ;;  %s1487_s22 = int_to_ptr.vmem [resolvable:$false] %s1486_s22 }
  0x22   : > { %1399 = vmatprep.subr.msk.mxu1 %vm911_vm2, %v897_v5  ;;  %1112 = vperm.xlu0 %1481, %v1330_v18   ;;  %s1482_s16 = scalar_lea.vmem %s1775_s11, 512  ;;  %s1488_s24 = scalar_lea.vmem %s1487_s22, 1024 }
  0x23   : > { %p1483_p12 = scmp.ne.s32.totalorder %s1775_s11, %s1482_s16  ;;  %p1489_p1 = scmp.lt.s32.totalorder %s1775_s11, %s1487_s22 }
  0x24   : > { %1373 = vmatmul.mubr.msk.f32.gmra.mrb[2].mxu1 %vm489_vm0, %v487_v6  ;;  %p1490_p2 = scmp.lt.s32.totalorder %s1488_s24, %s1482_s16 }
  0x25   : > { %1377 = vmatprep.mubr.msk.f32.mxu1 %vm593_vm3, %v588_v7  ;;  %p1484_p13 = pnand %p1483_p12, %p1661_p4 }
  0x26   : > { %p1491_p3 = por %p1490_p2, %p1489_p1 }
  0x27   : > { %p1485_p0 = pneg %p1484_p13 }
  0x28   : > { %1378 = vmatmul.mubr.msk.f32.vlgmr.msra.gmra.mrb[4].mxu1 %vm593_vm3, %v589_v8 }
  0x29   : > { %1380 = vmatprep.mubr.msk.f32.mxu1 %vm593_vm3, %v590_v9  ;;  %1400 = vmatpush3.msk.msra.mxu1 %vm911_vm2, %v897_v5  ;;  %p1492_p5 = pnand %p1491_p3, %p1485_p0 }
  0x2c   : > { %1381 = vmatmul.mubr.msk.f32.gmra.mrb[6].mxu1 %vm593_vm3, %v591_v10 }
  0x2d   : > { %1401 = vmatprep.mubr.msk.f32.mxu1 %vm898_vm4, %v893_v11 }
  0x30   : > { %1402 = vmatmul.mubr.msk.f32.vlgmr.msra.gmra.mrb[8].mxu1 %vm898_vm4, %v894_v12 }
  0x31   : > { %1404 = vmatprep.mubr.msk.f32.mxu1 %vm898_vm4, %v895_v13 }
  0x34   : > { %1405 = vmatmul.mubr.msk.f32.gmra.mrb[10].mxu1 %vm898_vm4, %v896_v14 }
  0xa1   : > { %v1113_v32 = vpop.permute.xlu0 %1112 }
  0xf3   : > { %v1371_v19 = vpop.f32.mrb[0].mxu1 }
  0xf4   : > { %v568_v20 = vpop.f32.mrb[1].mxu1 }
  0xf7   : > { %v1374_v21 = vpop.f32.mrb[2].mxu1 }
  0xf8   : > { %v578_v22 = vpop.f32.mrb[3].mxu1 }
  0xfb   : > { %v1379_v23 = vpop.f32.mrb[4].mxu1 }
  0xfc   : > { %v676_v24 = vpop.f32.mrb[5].mxu1 }
  0xfd   : > { %1385 = vmatprep.mubr.msk.f32.mxu0 %vm593_vm3, %v676_v24 }
  0xfe   : > { %1386 = vmatmul.mubr.msk.f32.vlgmr.msra.gmra.mrb[0].mxu0 %vm593_vm3, %v1379_v23 }
  0xff   : > { %v1382_v26 = vpop.f32.mrb[6].mxu1  ;;  %1392 = vmatpush3.msra.mxu0 %v587_v16 }
 0x100   : > { %v686_v27 = vpop.f32.mrb[7].mxu1  ;;  %1407 = vmatprep.subr.msk.mxu0 %vm911_vm2, %v1000_v25 }
 0x101   : > { %1388 = vmatprep.mubr.msk.f32.mxu0 %vm593_vm3, %v686_v27 }
 0x102   : > { %1389 = vmatmul.mubr.msk.f32.gmra.mrb[2].mxu0 %vm593_vm3, %v1382_v26 }
 0x103   : > { %1393 = vmatprep.mubr.msk.f32.mxu0 %vm489_vm0, %v568_v20  ;;  %v1403_v28 = vpop.f32.mrb[8].mxu1 }
 0x104   : > { %v981_v29 = vpop.f32.mrb[9].mxu1 }
 0x106   : > { %1394 = vmatmul.mubr.msk.f32.vlgmr.msra.gmra.mrb[0].mxu0 %vm489_vm0, %v1371_v19 }
 0x107   : > { %1396 = vmatprep.mubr.msk.f32.mxu0 %vm489_vm0, %v578_v22  ;;  %1408 = vmatpush3.msk.msra.mxu0 %vm911_vm2, %v1000_v25  ;;  %v1406_v30 = vpop.f32.mrb[10].mxu1 }
 0x108   : > { %v991_v31 = vpop.f32.mrb[11].mxu1 }
 0x10a   : > { %1397 = vmatmul.mubr.msk.f32.gmra.mrb[2].mxu0 %vm489_vm0, %v1374_v21 }
 0x10b   : > { %1409 = vmatprep.mubr.msk.f32.mxu0 %vm898_vm4, %v981_v29 }
 0x10e   : > { %1410 = vmatmul.mubr.msk.f32.vlgmr.msra.gmra.mrb[0].mxu0 %vm898_vm4, %v1403_v28 }
 0x10f   : > { %1412 = vmatprep.mubr.msk.f32.mxu0 %vm898_vm4, %v991_v31 }
 0x112   : > { %1413 = vmatmul.mubr.msk.f32.gmra.mrb[2].mxu0 %vm898_vm4, %v1406_v30 }
 0x1e1   : > { %v1411_v33 = vpop.f32.mrb[0].mxu0 }
 0x1e2   : > { %v1116_v34 = vadd.f32 %v1411_v33, %v1113_v32  ;;  %v1082_v35 = vpop.f32.mrb[1].mxu0 }
 0x1e3   : > { %v1115_v36 = vadd.f32 %v1113_v32, %v1082_v35 }
 0x1e4   : > { %1120 = vst [vmem:[%s449_s21 + $0x8] sm:$0xff] %v1116_v34 }
 0x1e5   : > { %1119 = vst [vmem:[%s449_s21] sm:$0xff] %v1115_v36  ;;  %v1414_v37 = vpop.f32.mrb[2].mxu0 }
 0x1e6   : > { %v1118_v38 = vadd.f32 %v1414_v37, %v1113_v32  ;;  %v1092_v39 = vpop.f32.mrb[3].mxu0 }
 0x1e7   : > { %v1117_v40 = vadd.f32 %v1113_v32, %v1092_v39 }
 0x1e8   : > { %1122 = vst [vmem:[%s449_s21 + $0x18] sm:$0xff] %v1118_v38 }
 0x1e9   : > { %1121 = vst [vmem:[%s449_s21 + $0x10] sm:$0xff] %v1117_v40 }
 0x1ea   : > { %1495 = shalt.err (!%p1492_p5)
}
 0x1eb   : > { %s1496_s27 = scalar_lea.hbm %s1780_s25, 512  ;;  %s1500_s29 = scalar_lea.hbm %s1838_s10, 1024 }
 0x1ec   : > { %p1497_p6 = scmp.ne.s32.totalorder %s1780_s25, %s1496_s27  ;;  %p1501_p10 = scmp.lt.u32.totalorder %s1780_s25, %s1838_s10 }
 0x1ed   : > { %p1502_p11 = scmp.lt.u32.totalorder %s1500_s29, %s1496_s27  ;;  %p1504_p13 = scmp.lt.u32.totalorder %s1496_s27, %s1780_s25 }
 0x1ee   : > { %p1498_p7 = pnand %p1497_p6, %p1661_p4 }
 0x1ef   : > { %p1503_p12 = por %p1502_p11, %p1501_p10 }
 0x1f0   : > { %p1499_p9 = pneg %p1498_p7 }
 0x1f1   : > { %p1505_p0 = por %p1504_p13, %p1503_p12 }
 0x1f3   : > { %p1506_p1 = pnand %p1505_p0, %p1499_p9 }
 0x1f5   : > { %1509 = shalt.err (!%p1506_p1)
}
 0x1f6   : > { %s1564_s15 = smov 128   ;;  %s1565_s26 = smov 8  }
 0x1f7   : > { %1423 = dma.vmem_to_hbm [thread:$0]  (%p1661_p4), %s1775_s11, 512, %s1780_s25, %s1782_s19, %s1564_s15, %s1564_s15, %s1565_s26  }
 0x1f8 PF: > { %p1429_p2 = scmp.ge.s32.totalorder %s1560_s18, 2  ;;  %s1154_s16 = sand.u32 1, %s1540_s13  }
 0x1f9   : > { %s1155_s20 = scalar_lea.sflag [#allocation3], %s1154_s16 }
 0x1fa   : > { %p1426_p3 = pnand %p1429_p2, %p1668_p8 }
 0x1fc   : > { %1535 = dma.done.wait (!%p1426_p3), %s1155_s20, 512  }
 0x1fd   : > { %1537 = vsyncadd (!%p1426_p3), %s1155_s20, 4294966784  ;;  %s23_s18 = sadd.s32 1, %s1560_s18   ;;  %s1851_s22 = sld [smem:[#allocation5_spill]] }
 0x1fe   : > { %p20_p5 = scmp.ge.s32.totalorder %s23_s18, 4   ;;  %s1852_s15 = sld [smem:[#allocation9_spill]] }
 0x1ff   : > { %s1853_s16 = sld [smem:[#allocation6_spill]]  ;;  %s1854_s17 = sld [smem:[#allocation7_spill]] }
 0x200   : > { %s1855_s13 = smov %s1544_s14  ;;  %22 = sbr.rel (!%p20_p5) target bundleno = 4 (0x4), region = 113 }
 0x203   : > { %s1856_s14 = smov %s1851_s22 }
 0x207   :  { %1160 = vsyncpa [#allocation3], 1 }
 0x208   :  { %1162 = vsyncpa [#allocation3 + $0x1], 1 }

</bundles_post_ra>
